<compile_context>
chip_gen: v7x
topology: tpu7x:2x2x1
jax: 0.10.0
libtpu: 0.0.40
codegen_flags: <defaults>
</compile_context>

<pallas_src>
import functools

import jax
import jax.numpy as jnp
from jax.experimental import pallas as pl
from jax.experimental.pallas import tpu as pltpu

_LANE = 128
_MAX_TILE_LANES = 256 * 1024   # 128K-256K lanes reaches ~85%+ of HBM roofline
_TMP_F32_TEMPS = 4             # estimated in-kernel f32 (C, tile_s) temporaries


def _ce2d_kernel(x_ref, t_ref, w_ref, num_ref, den_ref,
                 *, n_classes, n_batch_tile, tile_s, n_spatial, needs_mask):
    """One grid step: (bn, C, tile_s) logits block -> scalar (num, den) partials."""
    x = x_ref[...]                                   # (bn, C, tile_s) native dtype
    t = t_ref[...].astype(jnp.int32)                 # (bn, 1, tile_s)
    w = w_ref[...]                                   # (1,  C, 1) f32

    # Numerically stable log-sum-exp over the class (sublane) axis.
    # max / select stay in the input dtype (bf16 packs 2x on v6e/v7x);
    # exp/log/accumulation run in f32.
    m = jnp.max(x, axis=1, keepdims=True)                                 # (bn,1,ts)
    xf = x.astype(jnp.float32)
    mf = m.astype(jnp.float32)
    lse = jnp.log(jnp.sum(jnp.exp(xf - mf), axis=1, keepdims=True)) + mf  # f32

    # Fused one-hot gather of x[target] and weight[target] (no f32 one-hot,
    # no multiplies -- just compare + select + sublane reduce).
    classes = jax.lax.broadcasted_iota(
        jnp.int32, (n_batch_tile, n_classes, tile_s), 1)
    sel = classes == t                                                    # (bn,C,ts)
    x_t = jnp.sum(jnp.where(sel, x, jnp.zeros((), x.dtype)),
                  axis=1, keepdims=True).astype(jnp.float32)              # (bn,1,ts)
    w_t = jnp.sum(jnp.where(sel, w, 0.0), axis=1, keepdims=True)          # (bn,1,ts)

    # -w[t] * logp[t] = w[t] * (lse - x[t])   (logp never materialized)
    contrib = w_t * (lse - x_t)                                           # (bn,1,ts)

    if needs_mask:
        # Last spatial block may be partial: padded lanes hold garbage, which
        # can carry NaN/Inf through lse -- kill it with a select (not a
        # multiply by zero) on the per-lane result only.
        lane = (pl.program_id(1) * tile_s
                + jax.lax.broadcasted_iota(jnp.int32, (1, 1, tile_s), 2))
        valid = lane < n_spatial
        contrib = jnp.where(valid, contrib, 0.0)
        w_t = jnp.where(valid, w_t, 0.0)

    # Per-block scalar partials; the tiny (nb, n_sblk) grids are summed in JAX.
    num_ref[...] = jnp.sum(jnp.sum(contrib, axis=2, keepdims=True), axis=0)  # (1,1)
    den_ref[...] = jnp.sum(jnp.sum(w_t, axis=2, keepdims=True), axis=0)      # (1,1)


def cross_entropy_loss_2d(outputs, targets, weight, *, vmem_budget_bytes=None):
    """outputs: (N, C, H, W) float; targets: (N, H, W) int; weight: (C,) float."""
    N, C, H, W = outputs.shape
    S = H * W

    # Free, contiguous reshapes only (no transpose / pad / dtype copy in HBM).
    logits = outputs.reshape(N, C, S)
    if jnp.dtype(targets.dtype).itemsize > 4:       # 64-bit labels: narrow once
        targets = targets.astype(jnp.int32)
    tgts = targets.reshape(N, 1, S)                 # native dtype pass-through
    w3d = jnp.asarray(weight, dtype=jnp.float32).reshape(1, C, 1)

    x_item = jnp.dtype(outputs.dtype).itemsize
    t_item = jnp.dtype(tgts.dtype).itemsize

    # VMEM budget: double-buffered input blocks + in-kernel f32 temporaries.
    if vmem_budget_bytes is None:
        try:
            vmem_cap = int(pltpu.get_tpu_info().vmem_capacity_bytes)
        except Exception:
            vmem_cap = 64 * 1024 * 1024             # v7x-safe fallback
        vmem_budget_bytes = vmem_cap // 2
    per_lane = 2 * (C * x_item + t_item) + _TMP_F32_TEMPS * C * 4
    max_lanes = max(_LANE, (vmem_budget_bytes // per_lane) // _LANE * _LANE)
    max_lanes = min(max_lanes, _MAX_TILE_LANES)

    if S <= max_lanes:
        # Small images: whole spatial extent per step; pack several images per
        # block so each grid step still streams enough HBM to amortize the
        # fixed per-step overhead. (No partial-lane mask needed.)
        tile_s = S
        bn = max(d for d in range(1, N + 1) if N % d == 0 and d * S <= max_lanes)
        n_sblk = 1
    else:
        # Large images: lane-dense spatial tiles (multiple of 128), one image
        # per step; last block may be partial.
        # TODO(synk): a v7x-specific NHWC-tiled variant (classes on lanes)
        # would avoid sublane padding waste for very small C when VPU-bound.
        tile_s = max_lanes
        bn = 1
        n_sblk = pl.cdiv(S, tile_s)
    nb = N // bn
    needs_mask = (S % tile_s) != 0

    working_set = per_lane * bn * tile_s
    vmem_limit = min(96 * 1024 * 1024,
                     max(32 * 1024 * 1024, int(1.5 * working_set) + (2 << 20)))

    kernel = functools.partial(
        _ce2d_kernel, n_classes=C, n_batch_tile=bn, tile_s=tile_s,
        n_spatial=S, needs_mask=needs_mask)

    num, den = pl.pallas_call(
        kernel,
        out_shape=(jax.ShapeDtypeStruct((nb, n_sblk, 1, 1), jnp.float32),
                   jax.ShapeDtypeStruct((nb, n_sblk, 1, 1), jnp.float32)),
        grid_spec=pltpu.PrefetchScalarGridSpec(
            num_scalar_prefetch=0,
            grid=(nb, n_sblk),
            in_specs=[
                pl.BlockSpec((bn, C, tile_s), lambda n, s: (n, 0, s)),
                pl.BlockSpec((bn, 1, tile_s), lambda n, s: (n, 0, s)),
                pl.BlockSpec((1, C, 1), lambda n, s: (0, 0, 0)),
            ],
            out_specs=[
                pl.BlockSpec((None, None, 1, 1), lambda n, s: (n, s, 0, 0)),
                pl.BlockSpec((None, None, 1, 1), lambda n, s: (n, s, 0, 0)),
            ],
        ),
        compiler_params=pltpu.CompilerParams(
            dimension_semantics=("parallel", "parallel"),
            vmem_limit_bytes=vmem_limit,
        ),
    )(logits, tgts, w3d)

    # reduce=True, size_average=True -> weighted mean over all pixels/images.
    return jnp.sum(num) / jnp.sum(den)


def _reference(outputs, targets, weight):
    # pure-JAX reference of F.log_softmax(dim=1) + NLLLoss(weight, mean)
    logp = jax.nn.log_softmax(outputs.astype(jnp.float32), axis=1)
    N, C, H, W = outputs.shape
    lp = jnp.transpose(logp, (0, 2, 3, 1)).reshape(-1, C)
    t = targets.reshape(-1)
    picked = jnp.take_along_axis(lp, t[:, None], axis=1)[:, 0]
    w_t = jnp.asarray(weight, jnp.float32)[t]
    return jnp.sum(-w_t * picked) / jnp.sum(w_t)


if __name__ == "__main__":
    key = jax.random.PRNGKey(0)
    k1, k2, k3, k4, k5, k6 = jax.random.split(key, 6)

    # deterministic class weights (the module's __init__ takes `weight` of shape (C,))
    weight4 = jnp.array([1.0, 0.5, 2.0, 1.5], dtype=jnp.float32)

    # Test 1: small canonical shape -> batch-packed single grid step.
    N, C, H, W = 2, 4, 16, 16
    outputs = jax.random.normal(k1, (N, C, H, W), dtype=jnp.float32)
    targets = jax.random.randint(k2, (N, H, W), 0, C, dtype=jnp.int32)
    loss = cross_entropy_loss_2d(outputs, targets, weight4)
    jax.block_until_ready(loss)
    ref = _reference(outputs, targets, weight4)
    assert jnp.allclose(loss, ref, atol=1e-5, rtol=1e-5), (loss, ref)

    # Test 2: force tiny spatial tiles (budget knob) to exercise multi-block
    # spatial tiling and the partial-last-block mask path (S=180, tile_s=128).
    N2, C2, H2, W2 = 2, 4, 10, 18
    outputs2 = jax.random.normal(k3, (N2, C2, H2, W2), dtype=jnp.float32)
    targets2 = jax.random.randint(k4, (N2, H2, W2), 0, C2, dtype=jnp.int32)
    loss2 = cross_entropy_loss_2d(outputs2, targets2, weight4,
                                  vmem_budget_bytes=2048)
    jax.block_until_ready(loss2)
    ref2 = _reference(outputs2, targets2, weight4)
    assert jnp.allclose(loss2, ref2, atol=1e-5, rtol=1e-5), (loss2, ref2)

    # Test 3: bf16 logits exercise the native-dtype max/select path.
    N3, C3, H3, W3 = 2, 8, 12, 12
    weight8 = jnp.linspace(0.5, 2.0, C3, dtype=jnp.float32)
    outputs3 = jax.random.normal(k5, (N3, C3, H3, W3), dtype=jnp.float32)
    outputs3 = outputs3.astype(jnp.bfloat16)
    targets3 = jax.random.randint(k6, (N3, H3, W3), 0, C3, dtype=jnp.int32)
    loss3 = cross_entropy_loss_2d(outputs3, targets3, weight8)
    jax.block_until_ready(loss3)
    ref3 = _reference(outputs3, targets3, weight8)
    assert jnp.allclose(loss3, ref3, atol=1e-3, rtol=1e-3), (loss3, ref3)

    print("KERNEL_OK")
</pallas_src>

<mosaic_0001>
module attributes {stable_mosaic.version = 11 : i64} {
  func.func @_ce2d_kernel(%arg0: i32, %arg1: i32, %arg2: memref<2x4x256xf32, #tpu.memory_space<vmem>>, %arg3: memref<2x1x256xi32, #tpu.memory_space<vmem>>, %arg4: memref<1x4x1xf32, #tpu.memory_space<vmem>>, %arg5: memref<1x1x1x1xf32, #tpu.memory_space<vmem>>, %arg6: memref<1x1x1x1xf32, #tpu.memory_space<vmem>>) attributes {dimension_semantics = [#tpu.dimension_semantics<parallel>, #tpu.dimension_semantics<parallel>], iteration_bounds = array<i64: 1, 1>, scalar_prefetch = 0 : i64, scratch_operands = 0 : i64, tpu.core_type = #tpu.core_type<tc>, window_params = [{transform_indices = @transform_0, window_bounds = array<i64: 2, 4, 256>}, {transform_indices = @transform_1, window_bounds = array<i64: 2, 1, 256>}, {pipeline_mode = #tpu.pipeline_mode<synchronous>, transform_indices = @transform_2, window_bounds = array<i64: 1, 4, 1>}, {transform_indices = @transform_3, window_bounds = array<i64: 1, 1, 1, 1>}, {transform_indices = @transform_4, window_bounds = array<i64: 1, 1, 1, 1>}]} {
    %c0 = arith.constant 0 : index
    %c0_0 = arith.constant 0 : index
    %c0_1 = arith.constant 0 : index
    %0 = vector.load %arg2[%c0, %c0_0, %c0_1] : memref<2x4x256xf32, #tpu.memory_space<vmem>>, vector<2x4x256xf32>
    %c0_2 = arith.constant 0 : index
    %c0_3 = arith.constant 0 : index
    %c0_4 = arith.constant 0 : index
    %1 = vector.load %arg3[%c0_2, %c0_3, %c0_4] : memref<2x1x256xi32, #tpu.memory_space<vmem>>, vector<2x1x256xi32>
    %c0_5 = arith.constant 0 : index
    %c0_6 = arith.constant 0 : index
    %c0_7 = arith.constant 0 : index
    %2 = vector.load %arg4[%c0_5, %c0_6, %c0_7] : memref<1x4x1xf32, #tpu.memory_space<vmem>>, vector<1x4x1xf32>
    %cst = arith.constant dense<0xFF800000> : vector<2x256xf32>
    %3 = vector.multi_reduction <maximumf>, %0, %cst [1] : vector<2x4x256xf32> to vector<2x256xf32>
    %4 = vector.shape_cast %3 : vector<2x256xf32> to vector<2x1x256xf32>
    %5 = vector.broadcast %4 : vector<2x1x256xf32> to vector<2x4x256xf32>
    %6 = arith.subf %0, %5 : vector<2x4x256xf32>
    %7 = math.exp %6 : vector<2x4x256xf32>
    %cst_8 = arith.constant dense<0.000000e+00> : vector<2x256xf32>
    %8 = vector.multi_reduction <add>, %7, %cst_8 [1] : vector<2x4x256xf32> to vector<2x256xf32>
    %9 = vector.shape_cast %8 : vector<2x256xf32> to vector<2x1x256xf32>
    %10 = math.log %9 : vector<2x1x256xf32>
    %11 = arith.addf %10, %4 : vector<2x1x256xf32>
    %12 = tpu.iota {dimensions = array<i32: 1>} : vector<2x4x256xi32>
    %13 = vector.broadcast %1 : vector<2x1x256xi32> to vector<2x4x256xi32>
    %14 = arith.cmpi eq, %12, %13 : vector<2x4x256xi32>
    %cst_9 = arith.constant 0.000000e+00 : f32
    %15 = vector.broadcast %cst_9 : f32 to vector<2x4x256xf32>
    %16 = arith.select %14, %0, %15 : vector<2x4x256xi1>, vector<2x4x256xf32>
    %cst_10 = arith.constant dense<0.000000e+00> : vector<2x256xf32>
    %17 = vector.multi_reduction <add>, %16, %cst_10 [1] : vector<2x4x256xf32> to vector<2x256xf32>
    %18 = vector.shape_cast %17 : vector<2x256xf32> to vector<2x1x256xf32>
    %cst_11 = arith.constant 0.000000e+00 : f32
    %19 = vector.shape_cast %2 : vector<1x4x1xf32> to vector<1x4x1xf32>
    %20 = vector.broadcast %19 : vector<1x4x1xf32> to vector<2x4x256xf32>
    %21 = vector.broadcast %cst_11 : f32 to vector<2x4x256xf32>
    %22 = arith.select %14, %20, %21 : vector<2x4x256xi1>, vector<2x4x256xf32>
    %cst_12 = arith.constant dense<0.000000e+00> : vector<2x256xf32>
    %23 = vector.multi_reduction <add>, %22, %cst_12 [1] : vector<2x4x256xf32> to vector<2x256xf32>
    %24 = vector.shape_cast %23 : vector<2x256xf32> to vector<2x1x256xf32>
    %25 = arith.subf %11, %18 : vector<2x1x256xf32>
    %26 = arith.mulf %24, %25 : vector<2x1x256xf32>
    %cst_13 = arith.constant dense<0.000000e+00> : vector<2x1xf32>
    %27 = vector.multi_reduction <add>, %26, %cst_13 [2] : vector<2x1x256xf32> to vector<2x1xf32>
    %28 = vector.shape_cast %27 : vector<2x1xf32> to vector<2x1x1xf32>
    %cst_14 = arith.constant dense<0.000000e+00> : vector<1x1xf32>
    %29 = vector.multi_reduction <add>, %28, %cst_14 [0] : vector<2x1x1xf32> to vector<1x1xf32>
    %c0_15 = arith.constant 0 : index
    %c0_16 = arith.constant 0 : index
    %c0_17 = arith.constant 0 : index
    %c0_18 = arith.constant 0 : index
    %30 = vector.load %arg5[%c0_15, %c0_16, %c0_17, %c0_18] : memref<1x1x1x1xf32, #tpu.memory_space<vmem>>, vector<1x1x1x1xf32>
    %31 = vector.shape_cast %30 : vector<1x1x1x1xf32> to vector<1x1xf32>
    %32 = vector.shape_cast %29 : vector<1x1xf32> to vector<1x1x1x1xf32>
    tpu.vector_store %arg5[%c0_15, %c0_16, %c0_17, %c0_18], %32 {strides = array<i32>} : memref<1x1x1x1xf32, #tpu.memory_space<vmem>>, vector<1x1x1x1xf32>,
    %cst_19 = arith.constant dense<0.000000e+00> : vector<2x1xf32>
    %33 = vector.multi_reduction <add>, %24, %cst_19 [2] : vector<2x1x256xf32> to vector<2x1xf32>
    %34 = vector.shape_cast %33 : vector<2x1xf32> to vector<2x1x1xf32>
    %cst_20 = arith.constant dense<0.000000e+00> : vector<1x1xf32>
    %35 = vector.multi_reduction <add>, %34, %cst_20 [0] : vector<2x1x1xf32> to vector<1x1xf32>
    %c0_21 = arith.constant 0 : index
    %c0_22 = arith.constant 0 : index
    %c0_23 = arith.constant 0 : index
    %c0_24 = arith.constant 0 : index
    %36 = vector.load %arg6[%c0_21, %c0_22, %c0_23, %c0_24] : memref<1x1x1x1xf32, #tpu.memory_space<vmem>>, vector<1x1x1x1xf32>
    %37 = vector.shape_cast %36 : vector<1x1x1x1xf32> to vector<1x1xf32>
    %38 = vector.shape_cast %35 : vector<1x1xf32> to vector<1x1x1x1xf32>
    tpu.vector_store %arg6[%c0_21, %c0_22, %c0_23, %c0_24], %38 {strides = array<i32>} : memref<1x1x1x1xf32, #tpu.memory_space<vmem>>, vector<1x1x1x1xf32>,
    return
  }
  func.func @transform_0(%arg0: i32, %arg1: i32) -> (i32, i32, i32) {
    %c0_i32 = arith.constant 0 : i32
    %c0_i32_0 = arith.constant 0 : i32
    return %arg0, %c0_i32, %arg1 : i32, i32, i32
  }
  func.func @transform_1(%arg0: i32, %arg1: i32) -> (i32, i32, i32) {
    %c0_i32 = arith.constant 0 : i32
    %c0_i32_0 = arith.constant 0 : i32
    return %arg0, %c0_i32, %arg1 : i32, i32, i32
  }
  func.func @transform_2(%arg0: i32, %arg1: i32) -> (i32, i32, i32) {
    %c0_i32 = arith.constant 0 : i32
    %c0_i32_0 = arith.constant 0 : i32
    %c0_i32_1 = arith.constant 0 : i32
    %c0_i32_2 = arith.constant 0 : i32
    return %c0_i32, %c0_i32_0, %c0_i32_1 : i32, i32, i32
  }
  func.func @transform_3(%arg0: i32, %arg1: i32) -> (i32, i32, i32, i32) {
    %c0_i32 = arith.constant 0 : i32
    %c0_i32_0 = arith.constant 0 : i32
    %c0_i32_1 = arith.constant 0 : i32
    return %arg0, %arg1, %c0_i32, %c0_i32_0 : i32, i32, i32, i32
  }
  func.func @transform_4(%arg0: i32, %arg1: i32) -> (i32, i32, i32, i32) {
    %c0_i32 = arith.constant 0 : i32
    %c0_i32_0 = arith.constant 0 : i32
    %c0_i32_1 = arith.constant 0 : i32
    return %arg0, %arg1, %c0_i32, %c0_i32_0 : i32, i32, i32, i32
  }
}

</mosaic_0001>

<bundles_post_ra>
// kernel: tpu_custom_call.1
= control target key start
LH: loop header
LB: loop body
LE: loop exit
PB: predicated region body
PF: predicated region fallthrough
CT: control target
= control target key end

     0   :  { %10 = vsyncpa [#allocation3], 0  ;;  %s541_s0 = inlined_call_operand.hbm [shape: f32[2,4,256], index: 0, kind: input, shape index: {}]   ;;  %s542_s1 = inlined_call_operand.vmem [shape: s32[2,1,256], index: 1, kind: input, shape index: {}]   ;;  %s543_s2 = inlined_call_operand.vmem [shape: f32[1,4,1], index: 2, kind: input, shape index: {}]   ;;  %s544_s3 = inlined_call_operand.hbm [shape: f32[1,1,1,1], index: 3, kind: output, shape index: {0}]   ;;  %s545_s4 = inlined_call_operand.hbm [shape: f32[1,1,1,1], index: 4, kind: output, shape index: {1}]  }
   0x1   :  { %11 = vsyncpa [#allocation4], 0 }
   0x2   :  { %12 = vsyncpa [#allocation7], 0  ;;  %s370_s15 = smov [#allocation2]   ;;  %s298_s19 = scalar_lea.hbm %s541_s0, 256 }
   0x3   :  { %s18_s16 = sshll.u32 %s370_s15, 4  ;;  %p299_p0 = scmp.ne.s32.totalorder %s541_s0, %s298_s19  ;;  %s19_s16 = int_to_ptr.vmem [resolvable:$true] %s18_s16 }
   0x4   :  { %p302_p1 = scmp.lt.u32.totalorder %s298_s19, %s541_s0 }
   0x6   :  { %p304_p2 = pnand %p302_p1, %p299_p0 }
   0x8   :  { %307 = shalt.err (!%p304_p2)
}
   0x9   :  { %s308_s24 = scalar_lea.vmem %s19_s16, 256  ;;  %p313_p4 = scmp.lt.s32.totalorder %s19_s16, %s19_s16 }
   0xa   :  { %p309_p3 = scmp.ne.s32.totalorder %s19_s16, %s308_s24  ;;  %p314_p5 = scmp.lt.s32.totalorder %s308_s24, %s308_s24 }
   0xc   :  { %p315_p6 = por %p314_p5, %p313_p4 }
   0xe   :  { %p316_p7 = pnand %p315_p6, %p309_p3 }
  0x10   :  { %319 = shalt.err (!%p316_p7)
}
  0x11   :  { %s371_s25 = smov 128   ;;  %s372_s26 = smov 8  }
  0x12   :  { %24 = dma.hbm_to_vmem [thread:$0]  %s541_s0, 256, %s19_s16, [#allocation3], %s371_s25, %s371_s25, %s372_s26  }
  0x13   :  { %364 = dma.done.wait [#allocation3], 256  }
  0x14   :  { %365 = vsyncadd [#allocation3], 4294967040  ;;  %v373_v0 = vmov 0   ;;  %v36_v1 = vld [vmem:[%s543_s2] sm:$0xf]  ;;  %vm43_vm0 = vcmask 1043456   ;;  %v132_v43 = vlaneseq }
  0x15   :  { %283 = vset.pattern.permute.xlu0 %v373_v0  ;;  %v416_v2 = vld [vmem:[#allocation2] sm:$0xff]  ;;  %v422_v4 = vld [vmem:[#allocation2 + $0x8] sm:$0xff]  ;;  %vm238_vm5 = vcmask 0   ;;  %s375_s8 = smov [#allocation6]  }
  0x16   :  { %188 = vperm.xlu0 %283, %v36_v1   ;;  %v420_v3 = vcombine.high %v416_v2, %v416_v2  ;;  %v426_v5 = vcombine.high %v422_v4, %v422_v4  ;;  %v44_v7 = vsel %vm43_vm0, %v416_v2, -inf  ;;  %v58_v11 = vsel %vm43_vm0, %v422_v4, -inf  ;;  %v34_v56 = vld [vmem:[%s542_s1] sm:$0x3]  ;;  %v35_v58 = vld [vmem:[%s542_s1 + $0x2] sm:$0x3] }
  0x17   :  { %v45_v9 = vrot.slane %v44_v7, 4  ;;  %v59_v15 = vrot.slane %v58_v11, 4  ;;  %v453_v48 = vshrl.u32 %v132_v43, 7  ;;  %s374_s1 = smov [#allocation5]   ;;  %s264_s9 = sshll.u32 %s375_s8, 4  ;;  %s265_s9 = int_to_ptr.vmem [resolvable:$true] %s264_s9 }
  0x18   :  { %v51_v6 = vsel %vm43_vm0, %v420_v3, -inf  ;;  %v65_v10 = vsel %vm43_vm0, %v426_v5, -inf  ;;  %s254_s7 = sshll.u32 %s374_s1, 4  ;;  %s255_s7 = int_to_ptr.vmem [resolvable:$true] %s254_s7 }
  0x19   :  { %v52_v8 = vrot.slane %v51_v6, 4  ;;  %v66_v13 = vrot.slane %v65_v10, 4  ;;  %v46_v14 = vmax.f32 %v44_v7, %v45_v9  ;;  %v60_v19 = vmax.f32 %v58_v11, %v59_v15  ;;  %s320_s10 = scalar_lea.vmem %s255_s7, 16  ;;  %s324_s11 = scalar_lea.vmem %s255_s7, 32 }
  0x1a   :  { %v136_v53 = vsub.s32 0, %v453_v48  ;;  %v140_v55 = vsub.s32 1, %v453_v48  ;;  %p321_p8 = scmp.ne.s32.totalorder %s255_s7, %s320_s10  ;;  %p325_p9 = scmp.lt.s32.totalorder %s255_s7, %s255_s7 }
  0x1b   :  { %v53_v12 = vmax.f32 %v51_v6, %v52_v8  ;;  %v67_v16 = vmax.f32 %v65_v10, %v66_v13  ;;  %v47_v17 = vrot.slane %v46_v14, 2  ;;  %v61_v22 = vrot.slane %v60_v19, 2  ;;  %p326_p10 = scmp.lt.s32.totalorder %s324_s11, %s320_s10 }
  0x1c   :  { %v464_v61 = vrot.slane %v34_v56, %v136_v53  ;;  %v466_v63 = vrot.slane %v34_v56, %v140_v55  ;;  %v468_v0 = vrot.slane %v35_v58, %v136_v53  ;;  %v149_v10 = vrot.slane %v35_v58, %v140_v55 }
  0x1d   :  { %v54_v18 = vrot.slane %v53_v12, 2  ;;  %v48_v20 = vmax.f32 %v46_v14, %v47_v17  ;;  %v68_v23 = vrot.slane %v67_v16, 2  ;;  %v62_v26 = vmax.f32 %v60_v19, %v61_v22  ;;  %p327_p11 = por %p326_p10, %p325_p9 }
  0x1e   :  { %vm150_vm1 = vcmp.eq.s32.totalorder %v453_v48, %v464_v61  ;;  %vm151_vm2 = vcmp.eq.s32.totalorder %v453_v48, %v466_v63  ;;  %vm152_vm3 = vcmp.eq.s32.totalorder %v453_v48, %v468_v0  ;;  %vm153_vm4 = vcmp.eq.s32.totalorder %v453_v48, %v149_v10 }
  0x1f   :  { %v55_v21 = vmax.f32 %v53_v12, %v54_v18  ;;  %v49_v24 = vrot.slane %v48_v20, 1  ;;  %v69_v27 = vmax.f32 %v67_v16, %v68_v23  ;;  %v63_v30 = vrot.slane %v62_v26, 1  ;;  %p328_p12 = pnand %p327_p11, %p321_p8 }
  0x20   :  { %v154_v13 = vsel %vm150_vm1, %v416_v2, 0.0  ;;  %v155_v14 = vsel %vm151_vm2, %v420_v3, 0.0  ;;  %v156_v15 = vsel %vm152_vm3, %v422_v4, 0.0  ;;  %v157_v3 = vsel %vm153_vm4, %v426_v5, 0.0 }
  0x21   :  { %v56_v25 = vrot.slane %v55_v21, 1  ;;  %v436_v28 = vmax.f32 %v48_v20, %v49_v24  ;;  %v70_v31 = vrot.slane %v69_v27, 1  ;;  %v442_v33 = vmax.f32 %v62_v26, %v63_v30 }
  0x22   :  { %v158_v18 = vsel %vm43_vm0, %v154_v13, 0.0  ;;  %v179_v30 = vsel %vm43_vm0, %v157_v3, 0.0 }
  0x23   :  { %v438_v29 = vmax.f32 %v55_v21, %v56_v25  ;;  %v444_v34 = vmax.f32 %v69_v27, %v70_v31  ;;  %v172_v21 = vsel %vm43_vm0, %v156_v15, 0.0  ;;  %v159_v23 = vrot.slane %v158_v18, 4 }
  0x24   :  { %v173_v25 = vrot.slane %v172_v21, 4 }
  0x25   :  { %v76_v32 = vcombine.low %v436_v28, %v438_v29  ;;  %v77_v36 = vcombine.low %v442_v33, %v444_v34  ;;  %v160_v31 = vadd.f32 %v159_v23, %v158_v18 }
  0x27   :  { %v80_v35 = vsub.f32 %v416_v2, %v76_v32  ;;  %v81_v38 = vsub.f32 %v422_v4, %v77_v36  ;;  %v165_v2 = vsel %vm43_vm0, %v155_v14, 0.0 }
  0x28   :  { %v166_v4 = vrot.slane %v165_v2, 4 }
  0x29   :  { %v82_v37 = vmul.f32 1.442695, %v80_v35  ;;  %v84_v39 = vmul.f32 1.442695, %v81_v38  ;;  %v174_v35 = vadd.f32 %v173_v25, %v172_v21  ;;  %v161_v38 = vrot.slane %v160_v31, 2 }
  0x2a   :  { %v167_v32 = vadd.f32 %v166_v4, %v165_v2 }
  0x2b   :  { %286 = vpow2.f32 %v82_v37  ;;  %v180_v37 = vrot.slane %v179_v30, 4  ;;  %v175_v5 = vrot.slane %v174_v35, 2 }
  0x2c   :  { %288 = vpow2.f32 %v84_v39  ;;  %v168_v39 = vrot.slane %v167_v32, 2 }
  0x2e   :  { %v169_v43 = vadd.f32 %v168_v39, %v167_v32 }
  0x35   :  { %v287_v40 = vpop.eup %286 }
  0x36   :  { %v88_v41 = vcombine.high %v287_v40, %v287_v40  ;;  %v289_v42 = vpop.eup %288  ;;  %v92_v44 = vsel %vm43_vm0, %v287_v40, 0.0  ;;  %v181_v40 = vadd.f32 %v180_v37, %v179_v30 }
  0x37   :  { %v106_v45 = vsel %vm43_vm0, %v289_v42, 0.0  ;;  %v89_v47 = vcombine.high %v289_v42, %v289_v42  ;;  %v93_v49 = vrot.slane %v92_v44, 4  ;;  %v162_v42 = vadd.f32 %v161_v38, %v160_v31 }
  0x38   :  { %v99_v46 = vsel %vm43_vm0, %v88_v41, 0.0  ;;  %v107_v50 = vrot.slane %v106_v45, 4 }
  0x39   :  { %v100_v51 = vrot.slane %v99_v46, 4  ;;  %v113_v52 = vsel %vm43_vm0, %v89_v47, 0.0  ;;  %v94_v54 = vadd.f32 %v93_v49, %v92_v44  ;;  %v176_v44 = vadd.f32 %v175_v5, %v174_v35 }
  0x3a   :  { %v108_v57 = vadd.f32 %v107_v50, %v106_v45  ;;  %v114_v60 = vrot.slane %v113_v52, 4  ;;  %v163_v49 = vrot.slane %v162_v42, 1  ;;  %v170_v50 = vrot.slane %v169_v43, 1 }
  0x3b   :  { %v101_v59 = vadd.f32 %v100_v51, %v99_v46  ;;  %v95_v62 = vrot.slane %v94_v54, 2  ;;  %v182_v46 = vrot.slane %v181_v40, 2  ;;  %v177_v51 = vrot.slane %v176_v44, 1 }
  0x3c   :  { %v109_v1 = vrot.slane %v108_v57, 2  ;;  %v115_v7 = vadd.f32 %v114_v60, %v113_v52  ;;  %v171_v13 = vadd.f32 %v170_v50, %v169_v43 }
  0x3d   :  { %v102_v6 = vrot.slane %v101_v59, 2  ;;  %v96_v8 = vadd.f32 %v95_v62, %v94_v54  ;;  %v183_v56 = vadd.f32 %v182_v46, %v181_v40 }
  0x3e   :  { %v110_v9 = vadd.f32 %v109_v1, %v108_v57  ;;  %v116_v12 = vrot.slane %v115_v7, 2 }
  0x3f   :  { %v103_v11 = vadd.f32 %v102_v6, %v101_v59  ;;  %v97_v16 = vrot.slane %v96_v8, 1  ;;  %v184_v0 = vrot.slane %v183_v56, 1 }
  0x40   :  { %v111_v17 = vrot.slane %v110_v9, 1  ;;  %v117_v20 = vadd.f32 %v116_v12, %v115_v7  ;;  %v164_v12 = vadd.f32 %v163_v49, %v162_v42 }
  0x41   :  { %v104_v19 = vrot.slane %v103_v11, 1  ;;  %v98_v22 = vadd.f32 %v97_v16, %v96_v8 }
  0x42   :  { %v112_v24 = vadd.f32 %v111_v17, %v110_v9  ;;  %v118_v27 = vrot.slane %v117_v20, 1 }
  0x43   :  { %v105_v26 = vadd.f32 %v104_v19, %v103_v11  ;;  %290 = vlog2.f32 %v98_v22 }
  0x44   :  { %292 = vlog2.f32 %v112_v24  ;;  %v119_v36 = vadd.f32 %v118_v27, %v117_v20  ;;  %v178_v20 = vadd.f32 %v177_v51, %v176_v44  ;;  %v185_v24 = vadd.f32 %v184_v0, %v183_v56 }
  0x45   :  { %294 = vlog2.f32 %v105_v26 }
  0x46   :  { %296 = vlog2.f32 %v119_v36 }
  0x4d   :  { %v291_v41 = vpop.eup %290 }
  0x4e   :  { %v293_v45 = vpop.eup %292  ;;  %v121_v53 = vmul.f32 0.6931472, %v291_v41 }
  0x4f   :  { %v295_v47 = vpop.eup %294  ;;  %v125_v55 = vmul.f32 0.6931472, %v293_v45 }
  0x50   :  { %v123_v54 = vmul.f32 0.6931472, %v295_v47  ;;  %v297_v57 = vpop.eup %296  ;;  %v128_v17 = vadd.f32 %v121_v53, %v436_v28 }
  0x51   :  { %v127_v14 = vmul.f32 0.6931472, %v297_v57  ;;  %v130_v19 = vadd.f32 %v125_v55, %v442_v33 }
  0x52   :  { %v129_v18 = vadd.f32 %v123_v54, %v438_v29  ;;  %v223_v30 = vsub.f32 %v128_v17, %v164_v12 }
  0x53   :  { %v131_v23 = vadd.f32 %v127_v14, %v444_v34  ;;  %v225_v32 = vsub.f32 %v130_v19, %v178_v20 }
  0x54   :  { %v224_v31 = vsub.f32 %v129_v18, %v171_v13 }
  0x55   :  { %v226_v33 = vsub.f32 %v131_v23, %v185_v24 }
  0x95   :  { %v189_v52 = vpop.permute.xlu0 %188 }
  0x96   :  { %v191_v58 = vsel %vm150_vm1, %v189_v52, 0.0  ;;  %v192_v59 = vsel %vm151_vm2, %v189_v52, 0.0  ;;  %v193_v60 = vsel %vm152_vm3, %v189_v52, 0.0  ;;  %v194_v62 = vsel %vm153_vm4, %v189_v52, 0.0 }
  0x97   :  { %v195_v1 = vsel %vm43_vm0, %v191_v58, 0.0  ;;  %v202_v6 = vsel %vm43_vm0, %v192_v59, 0.0  ;;  %v209_v7 = vsel %vm43_vm0, %v193_v60, 0.0  ;;  %v216_v61 = vsel %vm43_vm0, %v194_v62, 0.0 }
  0x98   :  { %v196_v8 = vrot.slane %v195_v1, 4  ;;  %v203_v9 = vrot.slane %v202_v6, 4  ;;  %v210_v11 = vrot.slane %v209_v7, 4  ;;  %v217_v63 = vrot.slane %v216_v61, 4 }
  0x9a   :  { %v211_v15 = vadd.f32 %v210_v11, %v209_v7  ;;  %v218_v16 = vadd.f32 %v217_v63, %v216_v61  ;;  %v197_v48 = vadd.f32 %v196_v8, %v195_v1  ;;  %v204_v10 = vadd.f32 %v203_v9, %v202_v6 }
  0x9c   :  { %v198_v2 = vrot.slane %v197_v48, 2  ;;  %v205_v21 = vrot.slane %v204_v10, 2  ;;  %v212_v22 = vrot.slane %v211_v15, 2  ;;  %v219_v3 = vrot.slane %v218_v16, 2 }
  0x9e   :  { %v199_v4 = vadd.f32 %v198_v2, %v197_v48  ;;  %v206_v25 = vadd.f32 %v205_v21, %v204_v10  ;;  %v213_v26 = vadd.f32 %v212_v22, %v211_v15  ;;  %v220_v27 = vadd.f32 %v219_v3, %v218_v16 }
  0xa0   :  { %v200_v28 = vrot.slane %v199_v4, 1  ;;  %v207_v35 = vrot.slane %v206_v25, 1  ;;  %v214_v29 = vrot.slane %v213_v26, 1  ;;  %v221_v36 = vrot.slane %v220_v27, 1 }
  0xa2   :  { %v201_v37 = vadd.f32 %v200_v28, %v199_v4  ;;  %v208_v38 = vadd.f32 %v207_v35, %v206_v25  ;;  %v215_v39 = vadd.f32 %v214_v29, %v213_v26  ;;  %v222_v5 = vadd.f32 %v221_v36, %v220_v27 }
  0xa4   :  { %v240_v40 = vadd.f32 %v208_v38, %v201_v37  ;;  %v227_v41 = vmul.f32 %v223_v30, %v201_v37  ;;  %v228_v34 = vmul.f32 %v224_v31, %v208_v38  ;;  %v229_v42 = vmul.f32 %v225_v32, %v215_v39 }
  0xa5   :  { %v230_v43 = vmul.f32 %v226_v33, %v222_v5  ;;  %v243_v46 = vadd.f32 %v222_v5, %v215_v39 }
  0xa6   :  { %241 = vadd.xlane.f32.xlu1 %v240_v40  ;;  %v231_v44 = vadd.f32 %v228_v34, %v227_v41 }
  0xa7   :  { %v234_v45 = vadd.f32 %v230_v43, %v229_v42 }
  0xa8   :  { %232 = vadd.xlane.f32.xlu0 %v231_v44 }
  0xaa   :  { %235 = vadd.xlane.f32.xlu1 %v234_v45 }
  0xae   :  { %244 = vadd.xlane.f32.xlu1 %v243_v46 }
 0x133   :  { %v242_v47 = vpop.xlane.xlu1 %241 }
 0x135   :  { %v233_v49 = vpop.xlane.xlu0 %232 }
 0x137   :  { %v236_v50 = vpop.xlane.xlu1 %235 }
 0x138   :  { %v237_v51 = vadd.f32 %v236_v50, %v233_v49 }
 0x13a   :  { %239 = vst.msk [vmem:[#allocation5] sm:$0x1] %vm238_vm5, %v237_v51 }
 0x13b   :  { %v245_v52 = vpop.xlane.xlu1 %244 }
 0x13c   :  { %331 = shalt.err (!%p328_p12)
}
 0x13d   :  { %s332_s14 = scalar_lea.hbm %s544_s3, 16 }
 0x13e   :  { %p333_p13 = scmp.ne.s32.totalorder %s544_s3, %s332_s14  ;;  %p336_p0 = scmp.lt.u32.totalorder %s332_s14, %s544_s3 }
 0x140   :  { %p338_p1 = pnand %p336_p0, %p333_p13 }
 0x142   :  { %341 = shalt.err (!%p338_p1)
}
 0x143   :  { %257 = dma.vmem_to_hbm [thread:$0]  %s255_s7, 16, %s544_s3, [#allocation4]   ;;  %v246_v53 = vadd.f32 %v245_v52, %v242_v47 }
 0x144   :  { %s342_s21 = scalar_lea.vmem %s265_s9, 16  ;;  %s346_s22 = scalar_lea.vmem %s265_s9, 32 }
 0x145   :  { %247 = vst.msk [vmem:[#allocation6] sm:$0x1] %vm238_vm5, %v246_v53  ;;  %p343_p2 = scmp.ne.s32.totalorder %s265_s9, %s342_s21  ;;  %p347_p3 = scmp.lt.s32.totalorder %s265_s9, %s265_s9 }
 0x146   :  { %p348_p4 = scmp.lt.s32.totalorder %s346_s22, %s342_s21 }
 0x148   :  { %p349_p5 = por %p348_p4, %p347_p3 }
 0x14a   :  { %p350_p6 = pnand %p349_p5, %p343_p2 }
 0x14c   :  { %353 = shalt.err (!%p350_p6)
}
 0x14d   :  { %s354_s25 = scalar_lea.hbm %s545_s4, 16 }
 0x14e   :  { %p355_p7 = scmp.ne.s32.totalorder %s545_s4, %s354_s25  ;;  %p358_p8 = scmp.lt.u32.totalorder %s354_s25, %s545_s4 }
 0x150   :  { %p360_p9 = pnand %p358_p8, %p355_p7 }
 0x152   :  { %363 = shalt.err (!%p360_p9)
}
 0x153   :  { %267 = dma.vmem_to_hbm [thread:$0]  %s265_s9, 16, %s545_s4, [#allocation7]  }
 0x154   :  { %366 = dma.done.wait [#allocation4], 16  }
 0x155   :  { %367 = vsyncadd [#allocation4], 4294967280 }
 0x156   :  { %368 = dma.done.wait [#allocation7], 16  }
 0x157   :  { %369 = vsyncadd [#allocation7], 4294967280 }
 0x158   :  { %274 = vsyncpa [#allocation3], 1 }
 0x159   :  { %275 = vsyncpa [#allocation4], 1 }
 0x15a   :  { %276 = vsyncpa [#allocation7], 1 }

</bundles_post_ra>
